<compile_context>
chip_gen: v5e
topology: v5e:2x2
jax: 0.10.0
libtpu: 0.0.40
codegen_flags: <defaults>
</compile_context>

<pallas_src>
import functools

import jax
import jax.numpy as jnp
from jax.experimental import pallas as pl
from jax.experimental.pallas import tpu as pltpu


def _rms_pool_kernel(x_ref, sw_ref, bh_ref, o_ref, *, inv_window):
    # x_ref : (bc*H, W)
    # sw_ref: (W, W_out)         0/1 selection matrix, pools along W
    # bh_ref: (bc*H_out, bc*H)   block-diagonal 0/1 matrix, pools along H
    # o_ref : (bc*H_out, W_out)
    x = x_ref[...].astype(jnp.float32)
    x2 = x * x
    y = jnp.dot(x2, sw_ref[...], preferred_element_type=jnp.float32)
    z = jnp.dot(bh_ref[...], y, preferred_element_type=jnp.float32)
    o_ref[...] = jnp.sqrt(z * inv_window).astype(o_ref.dtype)


def _window_matrix(in_size, out_size, k, s, dtype=jnp.float32):
    """M[p, q] = 1 if q*s <= p < q*s + k else 0  -> shape (in_size, out_size)."""
    p = jnp.arange(in_size)[:, None]
    q = jnp.arange(out_size)[None, :]
    return ((p >= q * s) & (p < q * s + k)).astype(dtype)


@functools.partial(jax.jit, static_argnames=("kernel_size", "stride"))
def rms_pool(x, *, kernel_size, stride):
    """x: (N, C, H, W) -> (N, C, H_out, W_out), RMS pooling."""
    k = int(kernel_size)
    s = int(stride)
    n, c, h, w = x.shape
    h_out = (h - k) // s + 1
    w_out = (w - k) // s + 1
    nc = n * c

    # Images folded per grid step (row/sublane axis). Keep blocks aligned to 8
    # sublanes when tiling; otherwise fall back to a single full-size block.
    bc = max(1, min(nc, 512 // max(h, 1)))
    if nc % bc != 0 or (bc * h) % 8 != 0 or (bc * h_out) % 8 != 0:
        bc = nc
    nc_pad = ((nc + bc - 1) // bc) * bc

    x_rows = x.reshape(nc * h, w)
    if nc_pad != nc:
        x_rows = jnp.pad(x_rows, ((0, (nc_pad - nc) * h), (0, 0)))

    sw = _window_matrix(w, w_out, k, s)                       # (W, W_out)
    sh_t = _window_matrix(h, h_out, k, s).T                   # (H_out, H)
    bh = jnp.einsum("ab,ih->aibh", jnp.eye(bc, dtype=jnp.float32),
                    sh_t).reshape(bc * h_out, bc * h)         # block-diagonal

    kernel = functools.partial(_rms_pool_kernel, inv_window=1.0 / float(k * k))

    out_rows = pl.pallas_call(
        kernel,
        out_shape=jax.ShapeDtypeStruct((nc_pad * h_out, w_out), x.dtype),
        grid=(nc_pad // bc,),
        in_specs=[
            pl.BlockSpec((bc * h, w), lambda i: (i, 0)),
            pl.BlockSpec((w, w_out), lambda i: (0, 0)),
            pl.BlockSpec((bc * h_out, bc * h), lambda i: (0, 0)),
        ],
        out_specs=pl.BlockSpec((bc * h_out, w_out), lambda i: (i, 0)),
        compiler_params=pltpu.CompilerParams(
            dimension_semantics=("parallel",),
            vmem_limit_bytes=32 * 1024 * 1024),
    )(x_rows, sw, bh)

    return out_rows[: nc * h_out].reshape(n, c, h_out, w_out)


def _reference(x, kernel_size, stride):
    x2 = x.astype(jnp.float32) ** 2
    summed = jax.lax.reduce_window(
        x2, 0.0, jax.lax.add,
        window_dimensions=(1, 1, kernel_size, kernel_size),
        window_strides=(1, 1, stride, stride),
        padding="VALID")
    return jnp.sqrt(summed / (kernel_size * kernel_size)).astype(x.dtype)


if __name__ == "__main__":
    key = jax.random.PRNGKey(0)
    x = jax.random.normal(key, (2, 4, 16, 16), dtype=jnp.float32)

    # Non-overlapping (k == s) and overlapping (k > s) pooling configurations.
    for (ks, st) in ((2, 2), (3, 2)):
        out = rms_pool(x, kernel_size=ks, stride=st)
        out = jax.block_until_ready(out)
        ref = _reference(x, ks, st)
        assert out.shape == ref.shape, (out.shape, ref.shape)
        assert jnp.allclose(out, ref, atol=1e-5, rtol=1e-5), (ks, st)

    print("KERNEL_OK")
</pallas_src>

<mosaic_0001>
module attributes {stable_mosaic.version = 11 : i64} {
  func.func @_rms_pool_kernel(%arg0: i32, %arg1: memref<128x16xf32, #tpu.memory_space<vmem>>, %arg2: memref<16x8xf32, #tpu.memory_space<vmem>>, %arg3: memref<64x128xf32, #tpu.memory_space<vmem>>, %arg4: memref<64x8xf32, #tpu.memory_space<vmem>>) attributes {dimension_semantics = [#tpu.dimension_semantics<parallel>], iteration_bounds = array<i64: 1>, scalar_prefetch = 0 : i64, scratch_operands = 0 : i64, tpu.core_type = #tpu.core_type<tc>, window_params = [{transform_indices = @transform_0, window_bounds = array<i64: 128, 16>}, {pipeline_mode = #tpu.pipeline_mode<synchronous>, transform_indices = @transform_1, window_bounds = array<i64: 16, 8>}, {pipeline_mode = #tpu.pipeline_mode<synchronous>, transform_indices = @transform_2, window_bounds = array<i64: 64, 128>}, {transform_indices = @transform_3, window_bounds = array<i64: 64, 8>}]} {
    %c0 = arith.constant 0 : index
    %c0_0 = arith.constant 0 : index
    %0 = vector.load %arg1[%c0, %c0_0] : memref<128x16xf32, #tpu.memory_space<vmem>>, vector<128x16xf32>
    %1 = arith.mulf %0, %0 : vector<128x16xf32>
    %c0_1 = arith.constant 0 : index
    %c0_2 = arith.constant 0 : index
    %2 = vector.load %arg2[%c0_1, %c0_2] : memref<16x8xf32, #tpu.memory_space<vmem>>, vector<16x8xf32>
    %cst = arith.constant dense<0.000000e+00> : vector<128x8xf32>
    %3 = tpu.matmul %1, %2, %cst {dimension_numbers = #tpu.dot_dimension_numbers<[1], [0], [0], [1], [0, 0, 1, 1], [], []>} : vector<128x16xf32>, vector<16x8xf32>, vector<128x8xf32> -> vector<128x8xf32>
    %c0_3 = arith.constant 0 : index
    %c0_4 = arith.constant 0 : index
    %4 = vector.load %arg3[%c0_3, %c0_4] : memref<64x128xf32, #tpu.memory_space<vmem>>, vector<64x128xf32>
    %cst_5 = arith.constant dense<0.000000e+00> : vector<64x8xf32>
    %5 = tpu.matmul %4, %3, %cst_5 {dimension_numbers = #tpu.dot_dimension_numbers<[1], [0], [0], [1], [0, 0, 1, 1], [], []>} : vector<64x128xf32>, vector<128x8xf32>, vector<64x8xf32> -> vector<64x8xf32>
    %cst_6 = arith.constant 2.500000e-01 : f32
    %6 = vector.broadcast %cst_6 : f32 to vector<64x8xf32>
    %7 = arith.mulf %5, %6 : vector<64x8xf32>
    %8 = math.sqrt %7 : vector<64x8xf32>
    %c0_7 = arith.constant 0 : index
    %c0_8 = arith.constant 0 : index
    %9 = vector.load %arg4[%c0_7, %c0_8] : memref<64x8xf32, #tpu.memory_space<vmem>>, vector<64x8xf32>
    tpu.vector_store %arg4[%c0_7, %c0_8], %8 {strides = array<i32>} : memref<64x8xf32, #tpu.memory_space<vmem>>, vector<64x8xf32>,
    return
  }
  func.func @transform_0(%arg0: i32) -> (i32, i32) {
    %c0_i32 = arith.constant 0 : i32
    %c0_i32_0 = arith.constant 0 : i32
    return %arg0, %c0_i32 : i32, i32
  }
  func.func @transform_1(%arg0: i32) -> (i32, i32) {
    %c0_i32 = arith.constant 0 : i32
    %c0_i32_0 = arith.constant 0 : i32
    %c0_i32_1 = arith.constant 0 : i32
    return %c0_i32, %c0_i32_0 : i32, i32
  }
  func.func @transform_2(%arg0: i32) -> (i32, i32) {
    %c0_i32 = arith.constant 0 : i32
    %c0_i32_0 = arith.constant 0 : i32
    %c0_i32_1 = arith.constant 0 : i32
    return %c0_i32, %c0_i32_0 : i32, i32
  }
  func.func @transform_3(%arg0: i32) -> (i32, i32) {
    %c0_i32 = arith.constant 0 : i32
    %c0_i32_0 = arith.constant 0 : i32
    return %arg0, %c0_i32 : i32, i32
  }
}

</mosaic_0001>

<bundles_post_ra>
// kernel: rms_pool.1
= control target key start
LH: loop header
LB: loop body
LE: loop exit
PB: predicated region body
PF: predicated region fallthrough
CT: control target
= control target key end

     0   :  { %vm49_vm0 = vcmask 130048   ;;  %s586_s0 = inlined_call_operand.vmem [shape: f32[128,16], index: 0, kind: input, shape index: {}]   ;;  %s587_s1 = inlined_call_operand.vmem [shape: f32[16,8], index: 1, kind: input, shape index: {}]   ;;  %s588_s2 = inlined_call_operand.vmem [shape: f32[64,128], index: 2, kind: input, shape index: {}]   ;;  %s589_s3 = inlined_call_operand.hbm [shape: f32[64,8], index: 3, kind: output, shape index: {}]  }
   0x1   :  { %v48_v0 = vld [vmem:[%s587_s1 + $0x8] sm:$0xff]  ;;  %v47_v1 = vld [vmem:[%s587_s1] sm:$0xff]  ;;  %v22_v2 = vld [vmem:[%s586_s0 + $0x38] sm:$0xff] }
   0x2   :  { %359 = vmatpush.msra.mxu2 %v48_v0  ;;  %v38_v3 = vmul.f32 %v22_v2, %v22_v2  ;;  %112 = vmatpush.msra.mxu0 %v48_v0 }
   0x3   :  { %8 = vsyncpa [#allocation3], 0  ;;  %v15_v4 = vld [vmem:[%s586_s0] sm:$0xff]  ;;  %v16_v8 = vld [vmem:[%s586_s0 + $0x8] sm:$0xff]  ;;  %vm316_vm2 = vcmask 64512   ;;  %s331_s10 = sshll.u32 %s589_s3, 4  ;;  %s332_s10 = int_to_ptr.hbm [resolvable:$true] %s331_s10 }
   0x4   :  { %360 = vmatpush.msra.mxu2 %v47_v1  ;;  %113 = vmatpush.msra.mxu0 %v47_v1  ;;  %v23_v5 = vld [vmem:[%s586_s0 + $0x40] sm:$0xff]  ;;  %v31_v6 = vmul.f32 %v15_v4, %v15_v4  ;;  %v24_v9 = vld [vmem:[%s586_s0 + $0x48] sm:$0xff]  ;;  %v32_v10 = vmul.f32 %v16_v8, %v16_v8  ;;  %v17_v12 = vld [vmem:[%s586_s0 + $0x10] sm:$0xff]  ;;  %s423_s11 = smov 128   ;;  %s424_s12 = smov 8  }
   0x5   :  { %350 = vmatmul.msk.f32.vlgmr.msra.gmra.mxu2 %vm49_vm0, %v38_v3  ;;  %v39_v7 = vmul.f32 %v23_v5, %v23_v5  ;;  %v40_v11 = vmul.f32 %v24_v9, %v24_v9  ;;  %v25_v13 = vld [vmem:[%s586_s0 + $0x50] sm:$0xff]  ;;  %v33_v14 = vmul.f32 %v17_v12, %v17_v12  ;;  %v18_v16 = vld [vmem:[%s586_s0 + $0x18] sm:$0xff]  ;;  %v19_v20 = vld [vmem:[%s586_s0 + $0x20] sm:$0xff] }
   0x6   :  { %343 = vmatmul.msk.f32.vlgmr.msra.gmra.mxu0 %vm49_vm0, %v31_v6  ;;  %v41_v15 = vmul.f32 %v25_v13, %v25_v13  ;;  %v26_v17 = vld [vmem:[%s586_s0 + $0x58] sm:$0xff]  ;;  %v34_v18 = vmul.f32 %v18_v16, %v18_v16  ;;  %v27_v21 = vld [vmem:[%s586_s0 + $0x60] sm:$0xff]  ;;  %v35_v22 = vmul.f32 %v19_v20, %v19_v20  ;;  %v20_v24 = vld [vmem:[%s586_s0 + $0x28] sm:$0xff] }
   0x7   :  { %v42_v19 = vmul.f32 %v26_v17, %v26_v17  ;;  %v43_v23 = vmul.f32 %v27_v21, %v27_v21  ;;  %v36_v25 = vmul.f32 %v20_v24, %v20_v24  ;;  %v28_v26 = vld [vmem:[%s586_s0 + $0x68] sm:$0xff]  ;;  %v21_v28 = vld [vmem:[%s586_s0 + $0x30] sm:$0xff]  ;;  %v30_v32 = vld [vmem:[%s586_s0 + $0x78] sm:$0xff] }
   0x8   :  { %v44_v27 = vmul.f32 %v28_v26, %v28_v26  ;;  %v37_v29 = vmul.f32 %v21_v28, %v21_v28  ;;  %v29_v30 = vld [vmem:[%s586_s0 + $0x70] sm:$0xff]  ;;  %v46_v33 = vmul.f32 %v30_v32, %v30_v32  ;;  %v163_v50 = vld [vmem:[%s588_s2] sm:$0xff]  ;;  %v168_v51 = vld [vmem:[%s588_s2 + $0x28] sm:$0xff] }
   0x9   :  { %v45_v31 = vmul.f32 %v29_v30, %v29_v30  ;;  %v164_v52 = vld [vmem:[%s588_s2 + $0x8] sm:$0xff]  ;;  %v169_v53 = vld [vmem:[%s588_s2 + $0x30] sm:$0xff]  ;;  %v170_v55 = vld [vmem:[%s588_s2 + $0x38] sm:$0xff] }
   0xa   :  { %v165_v54 = vld [vmem:[%s588_s2 + $0x10] sm:$0xff]  ;;  %v166_v56 = vld [vmem:[%s588_s2 + $0x18] sm:$0xff]  ;;  %v167_v57 = vld [vmem:[%s588_s2 + $0x20] sm:$0xff]  ;;  %s422_s2 = smov [#allocation2]  }
   0xb   :  { %s329_s7 = sshll.u32 %s422_s2, 4  ;;  %s330_s7 = int_to_ptr.vmem [resolvable:$true] %s329_s7 }
   0xd   :  { %351 = vmatmul.msk.f32.gmra.mxu2 %vm49_vm0, %v39_v7 }
   0xe   :  { %344 = vmatmul.msk.f32.gmra.mxu0 %vm49_vm0, %v32_v10 }
  0x15   :  { %352 = vmatmul.msk.f32.gmra.mxu2 %vm49_vm0, %v40_v11 }
  0x16   :  { %345 = vmatmul.msk.f32.gmra.mxu0 %vm49_vm0, %v33_v14 }
  0x1d   :  { %353 = vmatmul.msk.f32.gmra.mxu2 %vm49_vm0, %v41_v15 }
  0x1e   :  { %346 = vmatmul.msk.f32.gmra.mxu0 %vm49_vm0, %v34_v18 }
  0x25   :  { %354 = vmatmul.msk.f32.gmra.mxu2 %vm49_vm0, %v42_v19 }
  0x26   :  { %347 = vmatmul.msk.f32.gmra.mxu0 %vm49_vm0, %v35_v22 }
  0x2d   :  { %355 = vmatmul.msk.f32.gmra.mxu2 %vm49_vm0, %v43_v23 }
  0x2e   :  { %348 = vmatmul.msk.f32.gmra.mxu0 %vm49_vm0, %v36_v25 }
  0x35   :  { %356 = vmatmul.msk.f32.gmra.mxu2 %vm49_vm0, %v44_v27 }
  0x36   :  { %349 = vmatmul.msk.f32.gmra.mxu0 %vm49_vm0, %v37_v29 }
  0x3d   :  { %357 = vmatmul.msk.f32.gmra.mxu2 %vm49_vm0, %v45_v31 }
  0x45   :  { %358 = vmatmul.msk.f32.gmra.mxu2 %vm49_vm0, %v46_v33 }
  0x83   :  { %v115_v37 = vpop.f32.mrf.mxu0 }
  0x88   :  { %v136_v34 = vpop.f32.mrf.mxu2 }
  0x8b   :  { %v118_v39 = vpop.f32.mrf.mxu0 }
  0x90   :  { %v139_v35 = vpop.f32.mrf.mxu2 }
  0x93   :  { %v121_v42 = vpop.f32.mrf.mxu0 }
  0x98   :  { %v142_v36 = vpop.f32.mrf.mxu2 }
  0x9b   :  { %v124_v44 = vpop.f32.mrf.mxu0 }
  0xa0   :  { %v145_v38 = vpop.f32.mrf.mxu2 }
  0xa3   :  { %v127_v46 = vpop.f32.mrf.mxu0 }
  0xa8   :  { %v148_v40 = vpop.f32.mrf.mxu2 }
  0xab   :  { %v130_v48 = vpop.f32.mrf.mxu0 }
  0xb0   :  { %v151_v41 = vpop.f32.mrf.mxu2 }
  0xb3   :  { %v133_v49 = vpop.f32.mrf.mxu0 }
  0xb8   :  { %v154_v43 = vpop.f32.mrf.mxu2 }
  0xc0   :  { %v157_v45 = vpop.f32.mrf.mxu2 }
  0xc8   :  { %v160_v47 = vpop.f32.mrf.mxu2 }
  0xc9   :  { %171 = vmatpush.msra.mxu1 %v160_v47  ;;  %361 = vmatpush.msra.mxu3 %v160_v47 }
  0xcb   :  { %172 = vmatpush.msra.mxu1 %v157_v45  ;;  %362 = vmatpush.msra.mxu3 %v157_v45 }
  0xcd   :  { %173 = vmatpush.msra.mxu1 %v154_v43  ;;  %363 = vmatpush.msra.mxu3 %v154_v43 }
  0xcf   :  { %174 = vmatpush.msra.mxu1 %v151_v41  ;;  %364 = vmatpush.msra.mxu3 %v151_v41 }
  0xd1   :  { %175 = vmatpush.msra.mxu1 %v148_v40  ;;  %365 = vmatpush.msra.mxu3 %v148_v40 }
  0xd3   :  { %176 = vmatpush.msra.mxu1 %v145_v38  ;;  %366 = vmatpush.msra.mxu3 %v145_v38 }
  0xd5   :  { %177 = vmatpush.msra.mxu1 %v142_v36  ;;  %367 = vmatpush.msra.mxu3 %v142_v36 }
  0xd7   :  { %178 = vmatpush.msra.mxu1 %v139_v35  ;;  %368 = vmatpush.msra.mxu3 %v139_v35 }
  0xd9   :  { %179 = vmatpush.msra.mxu1 %v136_v34  ;;  %369 = vmatpush.msra.mxu3 %v136_v34 }
  0xdb   :  { %180 = vmatpush.msra.mxu1 %v133_v49  ;;  %370 = vmatpush.msra.mxu3 %v133_v49 }
  0xdd   :  { %181 = vmatpush.msra.mxu1 %v130_v48  ;;  %371 = vmatpush.msra.mxu3 %v130_v48 }
  0xdf   :  { %182 = vmatpush.msra.mxu1 %v127_v46  ;;  %372 = vmatpush.msra.mxu3 %v127_v46 }
  0xe1   :  { %183 = vmatpush.msra.mxu1 %v124_v44  ;;  %373 = vmatpush.msra.mxu3 %v124_v44 }
  0xe3   :  { %184 = vmatpush.msra.mxu1 %v121_v42  ;;  %374 = vmatpush.msra.mxu3 %v121_v42 }
  0xe5   :  { %185 = vmatpush.msra.mxu1 %v118_v39  ;;  %375 = vmatpush.msra.mxu3 %v118_v39 }
  0xe7   :  { %186 = vmatpush.msra.mxu1 %v115_v37  ;;  %376 = vmatpush.msra.mxu3 %v115_v37 }
  0xe8   :  { %187 = vmatmul.f32.vlgmr.msra.gmra.mxu1 %v163_v50  ;;  %202 = vmatmul.f32.vlgmr.msra.gmra.mxu3 %v168_v51 }
  0xf0   :  { %190 = vmatmul.f32.gmra.mxu1 %v164_v52  ;;  %205 = vmatmul.f32.gmra.mxu3 %v169_v53 }
  0xf8   :  { %193 = vmatmul.f32.gmra.mxu1 %v165_v54  ;;  %208 = vmatmul.f32.gmra.mxu3 %v170_v55 }
 0x100   :  { %196 = vmatmul.f32.gmra.mxu1 %v166_v56 }
 0x108   :  { %199 = vmatmul.f32.gmra.mxu1 %v167_v57 }
 0x165   :  { %v188_v58 = vpop.f32.mrf.mxu1 }
 0x166   :  { %v212_v59 = vmul.f32 0.25, %v188_v58 }
 0x168   :  { %380 = vrsqrt.f32 %v212_v59  ;;  %vm227_vm1 = vcmp.eq.f32.partialorder %v212_v59, inf  ;;  %v230_v17 = vand.u32 2147483648, %v212_v59  ;;  %vm229_vm3 = vcmp.eq.f32.partialorder %v212_v59, 0.0 }
 0x16b   :  { %v203_v60 = vpop.f32.mrf.mxu3 }
 0x16c   :  { %v217_v61 = vmul.f32 0.25, %v203_v60 }
 0x16d   :  { %v191_v62 = vpop.f32.mrf.mxu1 }
 0x16e   :  { %v381_v63 = vpop.eup %380  ;;  %382 = vrsqrt.f32 %v217_v61  ;;  %v213_v1 = vmul.f32 0.25, %v191_v62  ;;  %vm287_vm4 = vcmp.eq.f32.partialorder %v217_v61, inf  ;;  %v290_v34 = vand.u32 2147483648, %v217_v61 }
 0x16f   :  { %v221_v0 = vmul.f32 %v381_v63, %v212_v59  ;;  %vm289_vm5 = vcmp.eq.f32.partialorder %v217_v61, 0.0 }
 0x170   :  { %384 = vrsqrt.f32 %v213_v1  ;;  %vm239_vm6 = vcmp.eq.f32.partialorder %v213_v1, inf  ;;  %v242_v42 = vand.u32 2147483648, %v213_v1  ;;  %vm241_vm7 = vcmp.eq.f32.partialorder %v213_v1, 0.0 }
 0x171   :  { %v222_v2 = vmul.f32 %v381_v63, %v221_v0 }
 0x173   :  { %v223_v3 = vmul.f32 0.5, %v222_v2  ;;  %v206_v4 = vpop.f32.mrf.mxu3 }
 0x174   :  { %v383_v5 = vpop.eup %382  ;;  %v539_v6 = vmul.f32 0.25, %v206_v4 }
 0x175   :  { %v224_v7 = vsub.f32 1.5, %v223_v3  ;;  %v281_v8 = vmul.f32 %v383_v5, %v217_v61  ;;  %v194_v9 = vpop.f32.mrf.mxu1 }
 0x176   :  { %386 = vrsqrt.f32 %v539_v6  ;;  %v385_v10 = vpop.eup %384  ;;  %v542_v13 = vmul.f32 0.25, %v194_v9  ;;  %vm299_vm8 = vcmp.eq.f32.partialorder %v539_v6, inf  ;;  %v302_v56 = vand.u32 2147483648, %v539_v6 }
 0x177   :  { %v225_v11 = vmul.f32 %v381_v63, %v224_v7  ;;  %v282_v12 = vmul.f32 %v383_v5, %v281_v8  ;;  %v233_v14 = vmul.f32 %v385_v10, %v213_v1  ;;  %vm301_vm9 = vcmp.eq.f32.partialorder %v539_v6, 0.0 }
 0x178   :  { %388 = vrsqrt.f32 %v542_v13  ;;  %vm251_vm10 = vcmp.eq.f32.partialorder %v542_v13, inf  ;;  %v254_v0 = vand.u32 2147483648, %v542_v13  ;;  %vm253_vm11 = vcmp.eq.f32.partialorder %v542_v13, 0.0 }
 0x179   :  { %v226_v15 = vmul.f32 %v225_v11, %v212_v59  ;;  %v283_v16 = vmul.f32 0.5, %v282_v12  ;;  %v234_v18 = vmul.f32 %v385_v10, %v233_v14 }
 0x17b   :  { %v228_v19 = vsel %vm227_vm1, %v212_v59, %v226_v15  ;;  %v284_v20 = vsub.f32 1.5, %v283_v16  ;;  %v209_v21 = vpop.f32.mrf.mxu3  ;;  %v235_v24 = vmul.f32 0.5, %v234_v18 }
 0x17c   :  { %v387_v22 = vpop.eup %386  ;;  %v231_v23 = vsel %vm229_vm3, %v230_v17, %v228_v19  ;;  %v545_v25 = vmul.f32 0.25, %v209_v21 }
 0x17d   :  { %317 = vst.msk [vmem:[#allocation2] sm:$0xff] %vm316_vm2, %v231_v23  ;;  %v285_v26 = vmul.f32 %v383_v5, %v284_v20  ;;  %v293_v27 = vmul.f32 %v387_v22, %v539_v6  ;;  %v197_v28 = vpop.f32.mrf.mxu1  ;;  %v236_v29 = vsub.f32 1.5, %v235_v24 }
 0x17e   :  { %390 = vrsqrt.f32 %v545_v25  ;;  %v389_v30 = vpop.eup %388  ;;  %v550_v33 = vmul.f32 0.25, %v197_v28  ;;  %vm311_vm12 = vcmp.eq.f32.partialorder %v545_v25, inf  ;;  %vm313_vm13 = vcmp.eq.f32.partialorder %v545_v25, 0.0 }
 0x17f   :  { %v286_v31 = vmul.f32 %v285_v26, %v217_v61  ;;  %v294_v32 = vmul.f32 %v387_v22, %v293_v27  ;;  %v237_v35 = vmul.f32 %v385_v10, %v236_v29  ;;  %v245_v36 = vmul.f32 %v389_v30, %v542_v13 }
 0x180   :  { %392 = vrsqrt.f32 %v550_v33  ;;  %v314_v10 = vand.u32 2147483648, %v545_v25  ;;  %vm263_vm14 = vcmp.eq.f32.partialorder %v550_v33, inf  ;;  %v266_v16 = vand.u32 2147483648, %v550_v33 }
 0x181   :  { %v288_v37 = vsel %vm287_vm4, %v217_v61, %v286_v31  ;;  %v295_v38 = vmul.f32 0.5, %v294_v32  ;;  %v238_v40 = vmul.f32 %v237_v35, %v213_v1  ;;  %v246_v41 = vmul.f32 %v389_v30, %v245_v36 }
 0x182   :  { %v291_v39 = vsel %vm289_vm5, %v290_v34, %v288_v37  ;;  %vm265_vm15 = vcmp.eq.f32.partialorder %v550_v33, 0.0 }
 0x183   :  { %322 = vst.msk [vmem:[#allocation2 + $0x28] sm:$0xff] %vm316_vm2, %v291_v39  ;;  %v296_v43 = vsub.f32 1.5, %v295_v38  ;;  %v240_v45 = vsel %vm239_vm6, %v213_v1, %v238_v40  ;;  %v247_v46 = vmul.f32 0.5, %v246_v41 }
 0x184   :  { %v391_v44 = vpop.eup %390  ;;  %v243_v47 = vsel %vm241_vm7, %v242_v42, %v240_v45 }
 0x185   :  { %v297_v48 = vmul.f32 %v387_v22, %v296_v43  ;;  %v305_v49 = vmul.f32 %v391_v44, %v545_v25  ;;  %v200_v50 = vpop.f32.mrf.mxu1  ;;  %318 = vst.msk [vmem:[#allocation2 + $0x8] sm:$0xff] %vm316_vm2, %v243_v47  ;;  %v248_v51 = vsub.f32 1.5, %v247_v46 }
 0x186   :  { %v216_v52 = vmul.f32 0.25, %v200_v50  ;;  %v393_v53 = vpop.eup %392 }
 0x187   :  { %v298_v54 = vmul.f32 %v297_v48, %v539_v6  ;;  %v306_v55 = vmul.f32 %v391_v44, %v305_v49  ;;  %v249_v57 = vmul.f32 %v389_v30, %v248_v51  ;;  %v257_v58 = vmul.f32 %v393_v53, %v550_v33 }
 0x188   :  { %394 = vrsqrt.f32 %v216_v52  ;;  %vm275_vm0 = vcmp.eq.f32.partialorder %v216_v52, inf  ;;  %v278_v23 = vand.u32 2147483648, %v216_v52  ;;  %vm277_vm1 = vcmp.eq.f32.partialorder %v216_v52, 0.0 }
 0x189   :  { %v300_v59 = vsel %vm299_vm8, %v539_v6, %v298_v54  ;;  %v307_v60 = vmul.f32 0.5, %v306_v55  ;;  %v250_v62 = vmul.f32 %v249_v57, %v542_v13  ;;  %v258_v63 = vmul.f32 %v393_v53, %v257_v58 }
 0x18a   :  { %v303_v61 = vsel %vm301_vm9, %v302_v56, %v300_v59 }
 0x18b   :  { %323 = vst.msk [vmem:[#allocation2 + $0x30] sm:$0xff] %vm316_vm2, %v303_v61  ;;  %v308_v1 = vsub.f32 1.5, %v307_v60  ;;  %v252_v2 = vsel %vm251_vm10, %v542_v13, %v250_v62  ;;  %v259_v3 = vmul.f32 0.5, %v258_v63 }
 0x18c   :  { %v255_v4 = vsel %vm253_vm11, %v254_v0, %v252_v2 }
 0x18d   :  { %v309_v5 = vmul.f32 %v391_v44, %v308_v1  ;;  %319 = vst.msk [vmem:[#allocation2 + $0x10] sm:$0xff] %vm316_vm2, %v255_v4  ;;  %v260_v7 = vsub.f32 1.5, %v259_v3 }
 0x18e   :  { %v395_v6 = vpop.eup %394 }
 0x18f   :  { %v310_v8 = vmul.f32 %v309_v5, %v545_v25  ;;  %v269_v9 = vmul.f32 %v395_v6, %v216_v52  ;;  %v261_v11 = vmul.f32 %v393_v53, %v260_v7 }
 0x191   :  { %v312_v12 = vsel %vm311_vm12, %v545_v25, %v310_v8  ;;  %v270_v13 = vmul.f32 %v395_v6, %v269_v9  ;;  %v262_v15 = vmul.f32 %v261_v11, %v550_v33 }
 0x192   :  { %v315_v14 = vsel %vm313_vm13, %v314_v10, %v312_v12 }
 0x193   :  { %324 = vst.msk [vmem:[#allocation2 + $0x38] sm:$0xff] %vm316_vm2, %v315_v14  ;;  %v271_v17 = vmul.f32 0.5, %v270_v13  ;;  %v264_v18 = vsel %vm263_vm14, %v550_v33, %v262_v15 }
 0x194   :  { %v267_v19 = vsel %vm265_vm15, %v266_v16, %v264_v18 }
 0x195   :  { %v272_v20 = vsub.f32 1.5, %v271_v17  ;;  %320 = vst.msk [vmem:[#allocation2 + $0x18] sm:$0xff] %vm316_vm2, %v267_v19 }
 0x197   :  { %v273_v21 = vmul.f32 %v395_v6, %v272_v20 }
 0x199   :  { %v274_v22 = vmul.f32 %v273_v21, %v216_v52 }
 0x19b   :  { %v276_v24 = vsel %vm275_vm0, %v216_v52, %v274_v22 }
 0x19c   :  { %v279_v25 = vsel %vm277_vm1, %v278_v23, %v276_v24 }
 0x19d   :  { %321 = vst.msk [vmem:[#allocation2 + $0x20] sm:$0xff] %vm316_vm2, %v279_v25 }
 0x19e   :  { %337 = dma.vmem_to_hbm [thread:$0]  %s330_s7, 1024, %s332_s10, [#allocation3], %s423_s11, %s423_s11, %s424_s12  }
 0x19f   :  { %420 = dma.done.wait [#allocation3], 1024  }
 0x1a0   :  { %421 = vsyncadd [#allocation3], 4294966272 }
 0x1a1   :  { %342 = vsyncpa [#allocation3], 1 }

</bundles_post_ra>
